<compile_context>
chip_gen: v7x
topology: tpu7x:2x2x1
jax: 0.10.0
libtpu: 0.0.40
codegen_flags: <defaults>
</compile_context>

<pallas_src>
import functools
import math

import jax
import jax.numpy as jnp
from jax.experimental import pallas as pl
from jax.experimental.pallas import tpu as pltpu


# MXU operand dtype for all matmuls (f32 accumulation is preserved).  bf16 MXU
# operands are valid on every generation (v5e 4x128^2, v6e/v7x 2x256^2) and
# roughly double-to-quadruple matmul throughput vs f32 operands.
# Set to None for exact f32 parity with the PyTorch module.
MATMUL_INPUT_DTYPE = jnp.bfloat16

# Single-buffer grid-invariant blocks (halves their VMEM footprint; matters on
# v7x's 64 MiB VMEM).  Flipped to False by the fallback in __main__ if this
# jaxlib rejects pl.Buffered(1).
SINGLE_BUFFER_RESIDENT = True


@functools.lru_cache()
def _chip_defaults():
    """(row-tile, vmem_limit_bytes) tuned per TPU generation."""
    try:
        info = pltpu.get_tpu_info()
        vmem = getattr(info, "vmem_capacity_bytes", None)
        if vmem is not None and vmem >= 100 * (1 << 20):   # v5e / v6e: 128 MiB VMEM
            return 512, 64 * (1 << 20)
    except Exception:
        pass
    return 256, 32 * (1 << 20)                             # v7x (64 MiB) / unknown


def _resident(block_shape, index_map):
    """Spec for a block whose index_map never changes along the streamed axis:
    single-buffered (no point double-buffering a block that is never re-DMA'd
    on the inner axis)."""
    if SINGLE_BUFFER_RESIDENT:
        return pl.BlockSpec(block_shape, index_map, pipeline_mode=pl.Buffered(1))
    return pl.BlockSpec(block_shape, index_map)


# ---------------------------------------------------------------------------
# Kernel 1: row-streamed linear  y = x @ w + b   (Q / K / V projections)
# ---------------------------------------------------------------------------
def _linear_bias_kernel(x_ref, w_ref, b_ref, o_ref, *, compute_dtype):
    x = x_ref[...]
    if compute_dtype is not None:
        x = x.astype(compute_dtype)          # streamed tile -> one cast per tile
    acc = jnp.dot(x, w_ref[...], preferred_element_type=jnp.float32)
    o_ref[...] = (acc + b_ref[...].astype(jnp.float32)).astype(o_ref.dtype)


def pallas_linear(x, w, b, *, tile_rows=None):
    """x: (M, K) f32 activations, w: (K, N) (possibly pre-cast bf16), b: (N,)."""
    M, K = x.shape
    N = w.shape[-1]
    default_tm, vmem_limit = _chip_defaults()
    tm = tile_rows or default_tm
    tm = M if M <= tm else tm                # whole-M tile is always legal
    compute_dtype = None if w.dtype == x.dtype else w.dtype

    return pl.pallas_call(
        functools.partial(_linear_bias_kernel, compute_dtype=compute_dtype),
        out_shape=jax.ShapeDtypeStruct((M, N), x.dtype),
        grid_spec=pltpu.PrefetchScalarGridSpec(
            num_scalar_prefetch=0,
            grid=(pl.cdiv(M, tm),),                           # ragged last tile is masked
            in_specs=[
                pl.BlockSpec((tm, K), lambda m: (m, 0)),      # streamed activation rows
                _resident((K, N), lambda m: (0, 0)),          # weight (resident)
                _resident((1, N), lambda m: (0, 0)),          # bias   (resident)
            ],
            out_specs=pl.BlockSpec((tm, N), lambda m: (m, 0)),
        ),
        compiler_params=pltpu.CompilerParams(
            dimension_semantics=("parallel",),
            vmem_limit_bytes=vmem_limit,
        ),
    )(x, w, b.reshape(1, N))


# ---------------------------------------------------------------------------
# Kernel 2: fused top-k time-delay aggregation + output projection
#   out[b, t] = (sum_i w[b, i] * v[b, (t + index[i]) % L]) @ Wo + bo
# ---------------------------------------------------------------------------
def _agg_out_proj_kernel(idx_ref, w_ref, v_ref, wo_ref, bo_ref, o_ref, v2_ref,
                         *, L, top_k, compute_dtype):
    b = pl.program_id(0)
    l = pl.program_id(1)
    tl = o_ref.shape[0]
    F = v_ref.shape[-1]

    # Stage this batch's values twice along time into VMEM once per batch, so
    # every circular shift is one dynamic-start contiguous slice (no (L, L)
    # selection matrix, values read from HBM exactly once).  The tl-row tail is
    # zeroed so reads issued for masked rows of a ragged last tile stay in
    # bounds of the scratch.
    @pl.when(l == 0)
    def _():
        v2_ref[pl.ds(0, L), :] = v_ref[...]
        v2_ref[pl.ds(L, L), :] = v_ref[...]
        v2_ref[pl.ds(2 * L, tl), :] = jnp.zeros((tl, F), v2_ref.dtype)

    row0 = l * tl
    acc = jnp.zeros((tl, F), jnp.float32)
    for i in range(top_k):                       # static, top_k = factor*log(L)
        shift = idx_ref[i]                       # int32 delay (scalar prefetch, SMEM)
        w = w_ref[b, i]                          # f32 softmax weight (SMEM)
        acc = acc + v2_ref[pl.ds(row0 + shift, tl), :].astype(jnp.float32) * w

    agg = acc if compute_dtype is None else acc.astype(compute_dtype)
    out = jnp.dot(agg, wo_ref[...], preferred_element_type=jnp.float32)
    o_ref[...] = (out + bo_ref[...].astype(jnp.float32)).astype(o_ref.dtype)


def pallas_agg_out_proj(index, weights, v, wo, bo, *, tile_rows=None):
    """index: (top_k,) int32, weights: (B, top_k) f32, v: (B, L, F),
    wo: (F, d_model) (possibly bf16), bo: (d_model,)."""
    B, L, F = v.shape
    dm = wo.shape[-1]
    top_k = index.shape[0]

    default_tl, vmem_limit = _chip_defaults()
    tl = tile_rows or default_tl
    tl = L if L <= tl else tl
    n_tiles = pl.cdiv(L, tl)

    compute_dtype = None if wo.dtype == v.dtype else wo.dtype
    kernel = functools.partial(_agg_out_proj_kernel, L=L, top_k=top_k,
                               compute_dtype=compute_dtype)

    return pl.pallas_call(
        kernel,
        out_shape=jax.ShapeDtypeStruct((B, L, dm), v.dtype),
        grid_spec=pltpu.PrefetchScalarGridSpec(
            num_scalar_prefetch=1,               # delay indices -> SMEM up front
            grid=(B, n_tiles),
            in_specs=[
                pl.BlockSpec(memory_space=pltpu.MemorySpace.SMEM),    # weights (B, top_k)
                _resident((None, L, F), lambda b, l, *_: (b, 0, 0)),  # v (resident / batch)
                _resident((F, dm), lambda b, l, *_: (0, 0)),          # Wo (resident)
                _resident((1, dm), lambda b, l, *_: (0, 0)),          # bo (resident)
            ],
            out_specs=pl.BlockSpec((None, tl, dm), lambda b, l, *_: (b, l, 0)),
            scratch_shapes=[pltpu.VMEM((2 * L + tl, F), v.dtype)],    # doubled values
        ),
        compiler_params=pltpu.CompilerParams(
            dimension_semantics=("parallel", "arbitrary"),
            vmem_limit_bytes=vmem_limit,
        ),
    )(index, weights, v, wo, bo.reshape(1, dm))


# ---------------------------------------------------------------------------
# AutoCorrelationLayer forward (inner AutoCorrelation: training-mode time-delay
# aggregation, output_attention=False; attn_mask ignored as in the reference).
# ---------------------------------------------------------------------------
def autocorrelation_layer_forward(params, queries, keys, values,
                                  attn_mask=None, *, n_heads, factor=1):
    del attn_mask, n_heads  # correlation/aggregation act per flattened channel,
                            # so the head split is numerically a no-op here.
    B, L, dm_in = queries.shape
    S = keys.shape[1]
    d_model = params["bo"].shape[0]

    wq, wk, wv, wo = params["wq"], params["wk"], params["wv"], params["wo"]
    if MATMUL_INPUT_DTYPE is not None and MATMUL_INPUT_DTYPE != queries.dtype:
        # Pre-cast weights once (HBM side): halves their DMA bytes and avoids
        # re-casting the resident weight block on every grid step.
        wq, wk, wv, wo = (w.astype(MATMUL_INPUT_DTYPE) for w in (wq, wk, wv, wo))

    # Q/K/V projections: three independent row-streamed matmuls (no activation
    # stack copy; queries/keys/values are distinct tensors in general).
    q = pallas_linear(queries.reshape(B * L, dm_in), wq, params["bq"]).reshape(B, L, -1)
    k = pallas_linear(keys.reshape(B * S, dm_in), wk, params["bk"]).reshape(B, S, -1)
    v = pallas_linear(values.reshape(B * S, dm_in), wv, params["bv"]).reshape(B, S, -1)

    # Align key/value length to the query length (Autoformer semantics).
    if L > S:
        k = jnp.pad(k, ((0, 0), (0, L - S), (0, 0)))
        v = jnp.pad(v, ((0, 0), (0, L - S), (0, 0)))
    else:
        k = k[:, :L]
        v = v[:, :L]

    # Period-based dependency discovery via FFT cross-correlation.
    # TODO(synk): rfft/irfft (and the conjugate multiply between them) have no
    # Pallas lowering; they stay in XLA where they fuse.
    q_fft = jnp.fft.rfft(q, axis=1)
    k_fft = jnp.fft.rfft(k, axis=1)
    corr = jnp.fft.irfft(q_fft * jnp.conj(k_fft), n=L, axis=1)       # (B, L, H*E)

    top_k = int(factor * math.log(L))
    if top_k <= 0:
        # Degenerate case (L <= 2): the reference aggregation loop is empty, so
        # the output projection sees all-zeros and returns just its bias.
        out = jnp.broadcast_to(params["bo"].astype(queries.dtype), (B, L, d_model))
        return out, None

    mean_value = jnp.mean(corr, axis=2)                              # (B, L)
    _, index = jax.lax.top_k(jnp.mean(mean_value, axis=0), top_k)    # (top_k,)
    weights = jnp.take(mean_value, index, axis=1)                    # (B, top_k)
    tmp_corr = jax.nn.softmax(weights, axis=-1).astype(jnp.float32)  # (B, top_k)

    out = pallas_agg_out_proj(index.astype(jnp.int32), tmp_corr, v, wo, params["bo"])
    return out, None  # output_attention=False


def init_params(key, d_model, n_heads, d_keys=None, d_values=None):
    d_keys = d_keys or d_model // n_heads
    d_values = d_values or d_model // n_heads
    ks = jax.random.split(key, 8)

    def lin(kw, kb, fan_in, fan_out):
        bound = 1.0 / math.sqrt(fan_in)  # torch.nn.Linear default init range
        w = jax.random.uniform(kw, (fan_in, fan_out), jnp.float32, -bound, bound)
        b = jax.random.uniform(kb, (fan_out,), jnp.float32, -bound, bound)
        return w, b

    wq, bq = lin(ks[0], ks[1], d_model, d_keys * n_heads)
    wk, bk = lin(ks[2], ks[3], d_model, d_keys * n_heads)
    wv, bv = lin(ks[4], ks[5], d_model, d_values * n_heads)
    wo, bo = lin(ks[6], ks[7], d_values * n_heads, d_model)
    return dict(wq=wq, bq=bq, wk=wk, bk=bk, wv=wv, bv=bv, wo=wo, bo=bo)


if __name__ == "__main__":
    B, L, S = 2, 16, 16
    d_model, n_heads = 128, 4   # keep projected feature axes lane-dense (>= 128)

    root = jax.random.PRNGKey(0)
    kp, kq, kk, kv = jax.random.split(root, 4)

    params = init_params(kp, d_model, n_heads)
    queries = jax.random.normal(kq, (B, L, d_model), jnp.float32)
    keys = jax.random.normal(kk, (B, S, d_model), jnp.float32)
    values = jax.random.normal(kv, (B, S, d_model), jnp.float32)

    def run():
        fwd = jax.jit(functools.partial(autocorrelation_layer_forward, n_heads=n_heads))
        out, attn = fwd(params, queries, keys, values, None)
        jax.block_until_ready(out)
        return out, attn

    try:
        out, attn = run()
    except Exception:
        # pl.Buffered(1) (single-buffered resident blocks; a v7x VMEM saving) is
        # the only optional feature used; retry with default double-buffering.
        SINGLE_BUFFER_RESIDENT = False
        out, attn = run()

    assert out.shape == (B, L, d_model), out.shape
    assert out.dtype == jnp.float32
    assert attn is None
    print("KERNEL_OK")
</pallas_src>

<mosaic_0001>
module attributes {stable_mosaic.version = 11 : i64} {
  func.func @_linear_bias_kernel(%arg0: i32, %arg1: memref<32x128xf32, #tpu.memory_space<vmem>>, %arg2: memref<128x128xbf16, #tpu.memory_space<vmem>>, %arg3: memref<1x128xf32, #tpu.memory_space<vmem>>, %arg4: memref<32x128xf32, #tpu.memory_space<vmem>>) attributes {dimension_semantics = [#tpu.dimension_semantics<parallel>], iteration_bounds = array<i64: 1>, scalar_prefetch = 0 : i64, scratch_operands = 0 : i64, tpu.core_type = #tpu.core_type<tc>, window_params = [{transform_indices = @transform_0, window_bounds = array<i64: 32, 128>}, {pipeline_mode = #tpu.pipeline_mode<synchronous>, transform_indices = @transform_1, window_bounds = array<i64: 128, 128>}, {pipeline_mode = #tpu.pipeline_mode<synchronous>, transform_indices = @transform_2, window_bounds = array<i64: 1, 128>}, {transform_indices = @transform_3, window_bounds = array<i64: 32, 128>}]} {
    %c0 = arith.constant 0 : index
    %c0_0 = arith.constant 0 : index
    %0 = vector.load %arg1[%c0, %c0_0] : memref<32x128xf32, #tpu.memory_space<vmem>>, vector<32x128xf32>
    %1 = arith.truncf %0 : vector<32x128xf32> to vector<32x128xbf16>
    %c0_1 = arith.constant 0 : index
    %c0_2 = arith.constant 0 : index
    %2 = vector.load %arg2[%c0_1, %c0_2] : memref<128x128xbf16, #tpu.memory_space<vmem>>, vector<128x128xbf16>
    %cst = arith.constant dense<0.000000e+00> : vector<32x128xf32>
    %3 = tpu.matmul %1, %2, %cst {dimension_numbers = #tpu.dot_dimension_numbers<[1], [0], [0], [1], [0, 0, 1, 1], [], []>} : vector<32x128xbf16>, vector<128x128xbf16>, vector<32x128xf32> -> vector<32x128xf32>
    %c0_3 = arith.constant 0 : index
    %c0_4 = arith.constant 0 : index
    %4 = vector.load %arg3[%c0_3, %c0_4] : memref<1x128xf32, #tpu.memory_space<vmem>>, vector<1x128xf32>
    %5 = vector.broadcast %4 : vector<1x128xf32> to vector<32x128xf32>
    %6 = arith.addf %3, %5 : vector<32x128xf32>
    %c0_5 = arith.constant 0 : index
    %c0_6 = arith.constant 0 : index
    %7 = vector.load %arg4[%c0_5, %c0_6] : memref<32x128xf32, #tpu.memory_space<vmem>>, vector<32x128xf32>
    tpu.vector_store %arg4[%c0_5, %c0_6], %6 {strides = array<i32>} : memref<32x128xf32, #tpu.memory_space<vmem>>, vector<32x128xf32>,
    return
  }
  func.func @transform_0(%arg0: i32) -> (i32, i32) {
    %c0_i32 = arith.constant 0 : i32
    %c0_i32_0 = arith.constant 0 : i32
    return %arg0, %c0_i32 : i32, i32
  }
  func.func @transform_1(%arg0: i32) -> (i32, i32) {
    %c0_i32 = arith.constant 0 : i32
    %c0_i32_0 = arith.constant 0 : i32
    %c0_i32_1 = arith.constant 0 : i32
    return %c0_i32, %c0_i32_0 : i32, i32
  }
  func.func @transform_2(%arg0: i32) -> (i32, i32) {
    %c0_i32 = arith.constant 0 : i32
    %c0_i32_0 = arith.constant 0 : i32
    %c0_i32_1 = arith.constant 0 : i32
    return %c0_i32, %c0_i32_0 : i32, i32
  }
  func.func @transform_3(%arg0: i32) -> (i32, i32) {
    %c0_i32 = arith.constant 0 : i32
    %c0_i32_0 = arith.constant 0 : i32
    return %arg0, %c0_i32 : i32, i32
  }
}

module attributes {stable_mosaic.version = 11 : i64} {
  func.func @_agg_out_proj_kernel(%arg0: i32, %arg1: i32, %arg2: memref<2xi32, #tpu.memory_space<smem>>, %arg3: memref<2x2xf32, #tpu.memory_space<smem>>, %arg4: memref<1x16x128xf32, #tpu.memory_space<vmem>>, %arg5: memref<128x128xbf16, #tpu.memory_space<vmem>>, %arg6: memref<1x128xf32, #tpu.memory_space<vmem>>, %arg7: memref<1x16x128xf32, #tpu.memory_space<vmem>>, %arg8: memref<48x128xf32, #tpu.memory_space<vmem>>) attributes {dimension_semantics = [#tpu.dimension_semantics<parallel>, #tpu.dimension_semantics<arbitrary>], iteration_bounds = array<i64: 2, 1>, scalar_prefetch = 1 : i64, scratch_operands = 1 : i64, tpu.core_type = #tpu.core_type<tc>, window_params = [{transform_indices = @transform_0, window_bounds = array<i64: 2, 2>}, {pipeline_mode = #tpu.pipeline_mode<synchronous>, transform_indices = @transform_1, window_bounds = array<i64: 1, 16, 128>}, {pipeline_mode = #tpu.pipeline_mode<synchronous>, transform_indices = @transform_2, window_bounds = array<i64: 128, 128>}, {pipeline_mode = #tpu.pipeline_mode<synchronous>, transform_indices = @transform_3, window_bounds = array<i64: 1, 128>}, {transform_indices = @transform_4, window_bounds = array<i64: 1, 16, 128>}]} {
    %c0_i32 = arith.constant 0 : i32
    %0 = arith.cmpi eq, %arg1, %c0_i32 : i32
    %1 = arith.extui %0 : i1 to i32
    %c0_i32_0 = arith.constant 0 : i32
    %2 = arith.cmpi ne, %1, %c0_i32_0 : i32
    scf.if %2 {
      %c0_13 = arith.constant 0 : index
      %c0_14 = arith.constant 0 : index
      %c0_15 = arith.constant 0 : index
      %32 = vector.load %arg4[%c0_13, %c0_14, %c0_15] : memref<1x16x128xf32, #tpu.memory_space<vmem>>, vector<1x16x128xf32>
      %33 = vector.shape_cast %32 : vector<1x16x128xf32> to vector<16x128xf32>
      %c0_16 = arith.constant 0 : index
      %c0_17 = arith.constant 0 : index
      %34 = vector.load %arg8[%c0_16, %c0_17] : memref<48x128xf32, #tpu.memory_space<vmem>>, vector<16x128xf32>
      tpu.vector_store %arg8[%c0_16, %c0_17], %33 {strides = array<i32>} : memref<48x128xf32, #tpu.memory_space<vmem>>, vector<16x128xf32>,
      %c0_18 = arith.constant 0 : index
      %c0_19 = arith.constant 0 : index
      %c0_20 = arith.constant 0 : index
      %35 = vector.load %arg4[%c0_18, %c0_19, %c0_20] : memref<1x16x128xf32, #tpu.memory_space<vmem>>, vector<1x16x128xf32>
      %36 = vector.shape_cast %35 : vector<1x16x128xf32> to vector<16x128xf32>
      %c16 = arith.constant 16 : index
      %c0_21 = arith.constant 0 : index
      %37 = vector.load %arg8[%c16, %c0_21] : memref<48x128xf32, #tpu.memory_space<vmem>>, vector<16x128xf32>
      tpu.vector_store %arg8[%c16, %c0_21], %36 {strides = array<i32>} : memref<48x128xf32, #tpu.memory_space<vmem>>, vector<16x128xf32>,
      %cst_22 = arith.constant 0.000000e+00 : f32
      %38 = vector.broadcast %cst_22 : f32 to vector<16x128xf32>
      %c32 = arith.constant 32 : index
      %c0_23 = arith.constant 0 : index
      %39 = vector.load %arg8[%c32, %c0_23] : memref<48x128xf32, #tpu.memory_space<vmem>>, vector<16x128xf32>
      tpu.vector_store %arg8[%c32, %c0_23], %38 {strides = array<i32>} : memref<48x128xf32, #tpu.memory_space<vmem>>, vector<16x128xf32>,
    } else {
    }
    %c16_i32 = arith.constant 16 : i32
    %3 = arith.muli %arg1, %c16_i32 : i32
    %cst = arith.constant 0.000000e+00 : f32
    %4 = vector.broadcast %cst : f32 to vector<16x128xf32>
    %c0 = arith.constant 0 : index
    %5 = memref.load %arg2[%c0] : memref<2xi32, #tpu.memory_space<smem>>
    %6 = arith.index_cast %arg0 : i32 to index
    %c0_1 = arith.constant 0 : index
    %7 = memref.load %arg3[%6, %c0_1] : memref<2x2xf32, #tpu.memory_space<smem>>
    %8 = arith.addi %3, %5 : i32
    %9 = arith.index_cast %8 : i32 to index
    %c0_2 = arith.constant 0 : index
    %10 = vector.load %arg8[%9, %c0_2] : memref<48x128xf32, #tpu.memory_space<vmem>>, vector<16x128xf32>
    %11 = vector.broadcast %7 : f32 to vector<16x128xf32>
    %12 = arith.mulf %10, %11 : vector<16x128xf32>
    %13 = arith.addf %4, %12 : vector<16x128xf32>
    %c1 = arith.constant 1 : index
    %14 = memref.load %arg2[%c1] : memref<2xi32, #tpu.memory_space<smem>>
    %15 = arith.index_cast %arg0 : i32 to index
    %c1_3 = arith.constant 1 : index
    %16 = memref.load %arg3[%15, %c1_3] : memref<2x2xf32, #tpu.memory_space<smem>>
    %17 = arith.addi %3, %14 : i32
    %18 = arith.index_cast %17 : i32 to index
    %c0_4 = arith.constant 0 : index
    %19 = vector.load %arg8[%18, %c0_4] : memref<48x128xf32, #tpu.memory_space<vmem>>, vector<16x128xf32>
    %20 = vector.broadcast %16 : f32 to vector<16x128xf32>
    %21 = arith.mulf %19, %20 : vector<16x128xf32>
    %22 = arith.addf %13, %21 : vector<16x128xf32>
    %23 = arith.truncf %22 : vector<16x128xf32> to vector<16x128xbf16>
    %c0_5 = arith.constant 0 : index
    %c0_6 = arith.constant 0 : index
    %24 = vector.load %arg5[%c0_5, %c0_6] : memref<128x128xbf16, #tpu.memory_space<vmem>>, vector<128x128xbf16>
    %cst_7 = arith.constant dense<0.000000e+00> : vector<16x128xf32>
    %25 = tpu.matmul %23, %24, %cst_7 {dimension_numbers = #tpu.dot_dimension_numbers<[1], [0], [0], [1], [0, 0, 1, 1], [], []>} : vector<16x128xbf16>, vector<128x128xbf16>, vector<16x128xf32> -> vector<16x128xf32>
    %c0_8 = arith.constant 0 : index
    %c0_9 = arith.constant 0 : index
    %26 = vector.load %arg6[%c0_8, %c0_9] : memref<1x128xf32, #tpu.memory_space<vmem>>, vector<1x128xf32>
    %27 = vector.broadcast %26 : vector<1x128xf32> to vector<16x128xf32>
    %28 = arith.addf %25, %27 : vector<16x128xf32>
    %c0_10 = arith.constant 0 : index
    %c0_11 = arith.constant 0 : index
    %c0_12 = arith.constant 0 : index
    %29 = vector.load %arg7[%c0_10, %c0_11, %c0_12] : memref<1x16x128xf32, #tpu.memory_space<vmem>>, vector<1x16x128xf32>
    %30 = vector.shape_cast %29 : vector<1x16x128xf32> to vector<16x128xf32>
    %31 = vector.shape_cast %28 : vector<16x128xf32> to vector<1x16x128xf32>
    tpu.vector_store %arg7[%c0_10, %c0_11, %c0_12], %31 {strides = array<i32>} : memref<1x16x128xf32, #tpu.memory_space<vmem>>, vector<1x16x128xf32>,
    return
  }
  func.func @transform_0(%arg0: i32, %arg1: i32, %arg2: memref<2xi32, #tpu.memory_space<smem>>) -> (i32, i32) {
    %c0_i32 = arith.constant 0 : i32
    %c0_i32_0 = arith.constant 0 : i32
    %c0_i32_1 = arith.constant 0 : i32
    return %c0_i32, %c0_i32_0 : i32, i32
  }
  func.func @transform_1(%arg0: i32, %arg1: i32, %arg2: memref<2xi32, #tpu.memory_space<smem>>) -> (i32, i32, i32) {
    %c0_i32 = arith.constant 0 : i32
    %c0_i32_0 = arith.constant 0 : i32
    %c0_i32_1 = arith.constant 0 : i32
    return %arg0, %c0_i32, %c0_i32_0 : i32, i32, i32
  }
  func.func @transform_2(%arg0: i32, %arg1: i32, %arg2: memref<2xi32, #tpu.memory_space<smem>>) -> (i32, i32) {
    %c0_i32 = arith.constant 0 : i32
    %c0_i32_0 = arith.constant 0 : i32
    %c0_i32_1 = arith.constant 0 : i32
    return %c0_i32, %c0_i32_0 : i32, i32
  }
  func.func @transform_3(%arg0: i32, %arg1: i32, %arg2: memref<2xi32, #tpu.memory_space<smem>>) -> (i32, i32) {
    %c0_i32 = arith.constant 0 : i32
    %c0_i32_0 = arith.constant 0 : i32
    %c0_i32_1 = arith.constant 0 : i32
    return %c0_i32, %c0_i32_0 : i32, i32
  }
  func.func @transform_4(%arg0: i32, %arg1: i32, %arg2: memref<2xi32, #tpu.memory_space<smem>>) -> (i32, i32, i32) {
    %c0_i32 = arith.constant 0 : i32
    %c0_i32_0 = arith.constant 0 : i32
    return %arg0, %arg1, %c0_i32 : i32, i32, i32
  }
}

module attributes {stable_mosaic.version = 11 : i64} {
  func.func @_linear_bias_kernel(%arg0: i32, %arg1: memref<32x128xf32, #tpu.memory_space<vmem>>, %arg2: memref<128x128xbf16, #tpu.memory_space<vmem>>, %arg3: memref<1x128xf32, #tpu.memory_space<vmem>>, %arg4: memref<32x128xf32, #tpu.memory_space<vmem>>) attributes {dimension_semantics = [#tpu.dimension_semantics<parallel>], iteration_bounds = array<i64: 1>, scalar_prefetch = 0 : i64, scratch_operands = 0 : i64, tpu.core_type = #tpu.core_type<tc>, window_params = [{transform_indices = @transform_0, window_bounds = array<i64: 32, 128>}, {pipeline_mode = #tpu.pipeline_mode<synchronous>, transform_indices = @transform_1, window_bounds = array<i64: 128, 128>}, {pipeline_mode = #tpu.pipeline_mode<synchronous>, transform_indices = @transform_2, window_bounds = array<i64: 1, 128>}, {transform_indices = @transform_3, window_bounds = array<i64: 32, 128>}]} {
    %c0 = arith.constant 0 : index
    %c0_0 = arith.constant 0 : index
    %0 = vector.load %arg1[%c0, %c0_0] : memref<32x128xf32, #tpu.memory_space<vmem>>, vector<32x128xf32>
    %1 = arith.truncf %0 : vector<32x128xf32> to vector<32x128xbf16>
    %c0_1 = arith.constant 0 : index
    %c0_2 = arith.constant 0 : index
    %2 = vector.load %arg2[%c0_1, %c0_2] : memref<128x128xbf16, #tpu.memory_space<vmem>>, vector<128x128xbf16>
    %cst = arith.constant dense<0.000000e+00> : vector<32x128xf32>
    %3 = tpu.matmul %1, %2, %cst {dimension_numbers = #tpu.dot_dimension_numbers<[1], [0], [0], [1], [0, 0, 1, 1], [], []>} : vector<32x128xbf16>, vector<128x128xbf16>, vector<32x128xf32> -> vector<32x128xf32>
    %c0_3 = arith.constant 0 : index
    %c0_4 = arith.constant 0 : index
    %4 = vector.load %arg3[%c0_3, %c0_4] : memref<1x128xf32, #tpu.memory_space<vmem>>, vector<1x128xf32>
    %5 = vector.broadcast %4 : vector<1x128xf32> to vector<32x128xf32>
    %6 = arith.addf %3, %5 : vector<32x128xf32>
    %c0_5 = arith.constant 0 : index
    %c0_6 = arith.constant 0 : index
    %7 = vector.load %arg4[%c0_5, %c0_6] : memref<32x128xf32, #tpu.memory_space<vmem>>, vector<32x128xf32>
    tpu.vector_store %arg4[%c0_5, %c0_6], %6 {strides = array<i32>} : memref<32x128xf32, #tpu.memory_space<vmem>>, vector<32x128xf32>,
    return
  }
  func.func @transform_0(%arg0: i32) -> (i32, i32) {
    %c0_i32 = arith.constant 0 : i32
    %c0_i32_0 = arith.constant 0 : i32
    return %arg0, %c0_i32 : i32, i32
  }
  func.func @transform_1(%arg0: i32) -> (i32, i32) {
    %c0_i32 = arith.constant 0 : i32
    %c0_i32_0 = arith.constant 0 : i32
    %c0_i32_1 = arith.constant 0 : i32
    return %c0_i32, %c0_i32_0 : i32, i32
  }
  func.func @transform_2(%arg0: i32) -> (i32, i32) {
    %c0_i32 = arith.constant 0 : i32
    %c0_i32_0 = arith.constant 0 : i32
    %c0_i32_1 = arith.constant 0 : i32
    return %c0_i32, %c0_i32_0 : i32, i32
  }
  func.func @transform_3(%arg0: i32) -> (i32, i32) {
    %c0_i32 = arith.constant 0 : i32
    %c0_i32_0 = arith.constant 0 : i32
    return %arg0, %c0_i32 : i32, i32
  }
}

module attributes {stable_mosaic.version = 11 : i64} {
  func.func @_agg_out_proj_kernel(%arg0: i32, %arg1: i32, %arg2: memref<2xi32, #tpu.memory_space<smem>>, %arg3: memref<2x2xf32, #tpu.memory_space<smem>>, %arg4: memref<1x16x128xf32, #tpu.memory_space<vmem>>, %arg5: memref<128x128xbf16, #tpu.memory_space<vmem>>, %arg6: memref<1x128xf32, #tpu.memory_space<vmem>>, %arg7: memref<1x16x128xf32, #tpu.memory_space<vmem>>, %arg8: memref<48x128xf32, #tpu.memory_space<vmem>>) attributes {dimension_semantics = [#tpu.dimension_semantics<parallel>, #tpu.dimension_semantics<arbitrary>], iteration_bounds = array<i64: 2, 1>, scalar_prefetch = 1 : i64, scratch_operands = 1 : i64, tpu.core_type = #tpu.core_type<tc>, window_params = [{transform_indices = @transform_0, window_bounds = array<i64: 2, 2>}, {transform_indices = @transform_1, window_bounds = array<i64: 1, 16, 128>}, {pipeline_mode = #tpu.pipeline_mode<synchronous>, transform_indices = @transform_2, window_bounds = array<i64: 128, 128>}, {pipeline_mode = #tpu.pipeline_mode<synchronous>, transform_indices = @transform_3, window_bounds = array<i64: 1, 128>}, {transform_indices = @transform_4, window_bounds = array<i64: 1, 16, 128>}]} {
    %c0_i32 = arith.constant 0 : i32
    %0 = arith.cmpi eq, %arg1, %c0_i32 : i32
    %1 = arith.extui %0 : i1 to i32
    %c0_i32_0 = arith.constant 0 : i32
    %2 = arith.cmpi ne, %1, %c0_i32_0 : i32
    scf.if %2 {
      %c0_13 = arith.constant 0 : index
      %c0_14 = arith.constant 0 : index
      %c0_15 = arith.constant 0 : index
      %32 = vector.load %arg4[%c0_13, %c0_14, %c0_15] : memref<1x16x128xf32, #tpu.memory_space<vmem>>, vector<1x16x128xf32>
      %33 = vector.shape_cast %32 : vector<1x16x128xf32> to vector<16x128xf32>
      %c0_16 = arith.constant 0 : index
      %c0_17 = arith.constant 0 : index
      %34 = vector.load %arg8[%c0_16, %c0_17] : memref<48x128xf32, #tpu.memory_space<vmem>>, vector<16x128xf32>
      tpu.vector_store %arg8[%c0_16, %c0_17], %33 {strides = array<i32>} : memref<48x128xf32, #tpu.memory_space<vmem>>, vector<16x128xf32>,
      %c0_18 = arith.constant 0 : index
      %c0_19 = arith.constant 0 : index
      %c0_20 = arith.constant 0 : index
      %35 = vector.load %arg4[%c0_18, %c0_19, %c0_20] : memref<1x16x128xf32, #tpu.memory_space<vmem>>, vector<1x16x128xf32>
      %36 = vector.shape_cast %35 : vector<1x16x128xf32> to vector<16x128xf32>
      %c16 = arith.constant 16 : index
      %c0_21 = arith.constant 0 : index
      %37 = vector.load %arg8[%c16, %c0_21] : memref<48x128xf32, #tpu.memory_space<vmem>>, vector<16x128xf32>
      tpu.vector_store %arg8[%c16, %c0_21], %36 {strides = array<i32>} : memref<48x128xf32, #tpu.memory_space<vmem>>, vector<16x128xf32>,
      %cst_22 = arith.constant 0.000000e+00 : f32
      %38 = vector.broadcast %cst_22 : f32 to vector<16x128xf32>
      %c32 = arith.constant 32 : index
      %c0_23 = arith.constant 0 : index
      %39 = vector.load %arg8[%c32, %c0_23] : memref<48x128xf32, #tpu.memory_space<vmem>>, vector<16x128xf32>
      tpu.vector_store %arg8[%c32, %c0_23], %38 {strides = array<i32>} : memref<48x128xf32, #tpu.memory_space<vmem>>, vector<16x128xf32>,
    } else {
    }
    %c16_i32 = arith.constant 16 : i32
    %3 = arith.muli %arg1, %c16_i32 : i32
    %cst = arith.constant 0.000000e+00 : f32
    %4 = vector.broadcast %cst : f32 to vector<16x128xf32>
    %c0 = arith.constant 0 : index
    %5 = memref.load %arg2[%c0] : memref<2xi32, #tpu.memory_space<smem>>
    %6 = arith.index_cast %arg0 : i32 to index
    %c0_1 = arith.constant 0 : index
    %7 = memref.load %arg3[%6, %c0_1] : memref<2x2xf32, #tpu.memory_space<smem>>
    %8 = arith.addi %3, %5 : i32
    %9 = arith.index_cast %8 : i32 to index
    %c0_2 = arith.constant 0 : index
    %10 = vector.load %arg8[%9, %c0_2] : memref<48x128xf32, #tpu.memory_space<vmem>>, vector<16x128xf32>
    %11 = vector.broadcast %7 : f32 to vector<16x128xf32>
    %12 = arith.mulf %10, %11 : vector<16x128xf32>
    %13 = arith.addf %4, %12 : vector<16x128xf32>
    %c1 = arith.constant 1 : index
    %14 = memref.load %arg2[%c1] : memref<2xi32, #tpu.memory_space<smem>>
    %15 = arith.index_cast %arg0 : i32 to index
    %c1_3 = arith.constant 1 : index
    %16 = memref.load %arg3[%15, %c1_3] : memref<2x2xf32, #tpu.memory_space<smem>>
    %17 = arith.addi %3, %14 : i32
    %18 = arith.index_cast %17 : i32 to index
    %c0_4 = arith.constant 0 : index
    %19 = vector.load %arg8[%18, %c0_4] : memref<48x128xf32, #tpu.memory_space<vmem>>, vector<16x128xf32>
    %20 = vector.broadcast %16 : f32 to vector<16x128xf32>
    %21 = arith.mulf %19, %20 : vector<16x128xf32>
    %22 = arith.addf %13, %21 : vector<16x128xf32>
    %23 = arith.truncf %22 : vector<16x128xf32> to vector<16x128xbf16>
    %c0_5 = arith.constant 0 : index
    %c0_6 = arith.constant 0 : index
    %24 = vector.load %arg5[%c0_5, %c0_6] : memref<128x128xbf16, #tpu.memory_space<vmem>>, vector<128x128xbf16>
    %cst_7 = arith.constant dense<0.000000e+00> : vector<16x128xf32>
    %25 = tpu.matmul %23, %24, %cst_7 {dimension_numbers = #tpu.dot_dimension_numbers<[1], [0], [0], [1], [0, 0, 1, 1], [], []>} : vector<16x128xbf16>, vector<128x128xbf16>, vector<16x128xf32> -> vector<16x128xf32>
    %c0_8 = arith.constant 0 : index
    %c0_9 = arith.constant 0 : index
    %26 = vector.load %arg6[%c0_8, %c0_9] : memref<1x128xf32, #tpu.memory_space<vmem>>, vector<1x128xf32>
    %27 = vector.broadcast %26 : vector<1x128xf32> to vector<16x128xf32>
    %28 = arith.addf %25, %27 : vector<16x128xf32>
    %c0_10 = arith.constant 0 : index
    %c0_11 = arith.constant 0 : index
    %c0_12 = arith.constant 0 : index
    %29 = vector.load %arg7[%c0_10, %c0_11, %c0_12] : memref<1x16x128xf32, #tpu.memory_space<vmem>>, vector<1x16x128xf32>
    %30 = vector.shape_cast %29 : vector<1x16x128xf32> to vector<16x128xf32>
    %31 = vector.shape_cast %28 : vector<16x128xf32> to vector<1x16x128xf32>
    tpu.vector_store %arg7[%c0_10, %c0_11, %c0_12], %31 {strides = array<i32>} : memref<1x16x128xf32, #tpu.memory_space<vmem>>, vector<1x16x128xf32>,
    return
  }
  func.func @transform_0(%arg0: i32, %arg1: i32, %arg2: memref<2xi32, #tpu.memory_space<smem>>) -> (i32, i32) {
    %c0_i32 = arith.constant 0 : i32
    %c0_i32_0 = arith.constant 0 : i32
    %c0_i32_1 = arith.constant 0 : i32
    return %c0_i32, %c0_i32_0 : i32, i32
  }
  func.func @transform_1(%arg0: i32, %arg1: i32, %arg2: memref<2xi32, #tpu.memory_space<smem>>) -> (i32, i32, i32) {
    %c0_i32 = arith.constant 0 : i32
    %c0_i32_0 = arith.constant 0 : i32
    %c0_i32_1 = arith.constant 0 : i32
    return %arg0, %c0_i32, %c0_i32_0 : i32, i32, i32
  }
  func.func @transform_2(%arg0: i32, %arg1: i32, %arg2: memref<2xi32, #tpu.memory_space<smem>>) -> (i32, i32) {
    %c0_i32 = arith.constant 0 : i32
    %c0_i32_0 = arith.constant 0 : i32
    %c0_i32_1 = arith.constant 0 : i32
    return %c0_i32, %c0_i32_0 : i32, i32
  }
  func.func @transform_3(%arg0: i32, %arg1: i32, %arg2: memref<2xi32, #tpu.memory_space<smem>>) -> (i32, i32) {
    %c0_i32 = arith.constant 0 : i32
    %c0_i32_0 = arith.constant 0 : i32
    %c0_i32_1 = arith.constant 0 : i32
    return %c0_i32, %c0_i32_0 : i32, i32
  }
  func.func @transform_4(%arg0: i32, %arg1: i32, %arg2: memref<2xi32, #tpu.memory_space<smem>>) -> (i32, i32, i32) {
    %c0_i32 = arith.constant 0 : i32
    %c0_i32_0 = arith.constant 0 : i32
    return %arg0, %arg1, %c0_i32 : i32, i32, i32
  }
}

</mosaic_0001>

<bundles_post_ra>
// kernel: reverse.0
= control target key start
LH: loop header
LB: loop body
LE: loop exit
PB: predicated region body
PF: predicated region fallthrough
CT: control target
= control target key end

     0   :  { %v40_v2 = vld [vmem:[#allocation0 + $0x7] ss:$-1 sm:$0xff]  ;;  %v47_v3 = vlaneseq  ;;  %v54_v5 = vld [vmem:[#allocation0 + $0x17] ss:$-1 sm:$0xff]  ;;  %s135_s0 = inlined_call_operand.vmem [shape: f32[2,128,7], index: 0, kind: input, shape index: {}]   ;;  %s136_s1 = inlined_call_operand.vmem [shape: f32[2,128,7], index: 1, kind: output, shape index: {}]  }
   0x1   :  { %v32_v0 = vld [vmem:[%s135_s0] sm:$0xff]  ;;  %v34_v1 = vld [vmem:[%s135_s0 + $0x8] sm:$0xff]  ;;  %v41_v4 = vrot.slane %v40_v2, 1  ;;  %v55_v6 = vrot.slane %v54_v5, 1 }
   0x2   :  { %33 = vst [vmem:[#allocation0 + $0x8] sm:$0xff] %v32_v0  ;;  %35 = vst [vmem:[#allocation0 + $0x18] sm:$0xff] %v34_v1  ;;  %v48_v7 = vshrl.u32 %v47_v3, 7 }
   0x3   :  { %42 = vst [vmem:[#allocation1] sm:$0xff] %v41_v4  ;;  %56 = vst [vmem:[#allocation1 + $0x8] sm:$0xff] %v55_v6 }
   0x4   :  { %vm49_vm0 = vcmp.lt.s32.totalorder %v48_v7, 7 }
   0x9   :  { %v45_v8 = vld [vmem:[#allocation0 + $0xf] ss:$-1 sm:$0xff]  ;;  %v59_v9 = vld [vmem:[#allocation0 + $0x1f] ss:$-1 sm:$0xff] }
   0xa   :  { %v46_v10 = vrot.slane %v45_v8, 1  ;;  %v60_v11 = vrot.slane %v59_v9, 1 }
   0xc   :  { %50 = vst.msk [vmem:[#allocation1] sm:$0xff] %vm49_vm0, %v46_v10  ;;  %64 = vst.msk [vmem:[#allocation1 + $0x8] sm:$0xff] %vm49_vm0, %v60_v11 }
  0x13   :  { %v94_v12 = vld [vmem:[#allocation1] sm:$0xff]  ;;  %v96_v13 = vld [vmem:[#allocation1 + $0x8] sm:$0xff] }
  0x14   :  { %95 = vst [vmem:[%s136_s1] sm:$0xff] %v94_v12  ;;  %97 = vst [vmem:[%s136_s1 + $0x8] sm:$0xff] %v96_v13 }

// kernel: autocorrelation_layer_forward.5
= control target key start
LH: loop header
LB: loop body
LE: loop exit
PB: predicated region body
PF: predicated region fallthrough
CT: control target
= control target key end

     0   :  { %s267_s1 = inlined_call_operand.vmem [shape: bf16[128,128], index: 1, kind: input, shape index: {}]   ;;  %s268_s0 = inlined_call_operand.vmem [shape: f32[32,128], index: 0, kind: input, shape index: {}]   ;;  %s269_s2 = inlined_call_operand.vmem [shape: f32[1,128], index: 2, kind: input, shape index: {}]   ;;  %s270_s3 = inlined_call_operand.vmem [shape: f32[32,128], index: 3, kind: output, shape index: {}]  }
   0x1   :  { %v188_v0 = vld [vmem:[%s267_s1] sm:$0xff]   ;;  %v189_v1 = vld [vmem:[%s267_s1 + $0x8] sm:$0xff]   ;;  %v190_v2 = vld [vmem:[%s267_s1 + $0x10] sm:$0xff]  }
   0x2   :  { %168 = vmatprep.subr.bf16.mxu0 %v188_v0  ;;  %v191_v3 = vld [vmem:[%s267_s1 + $0x18] sm:$0xff]   ;;  %v15_v4 = vld [vmem:[%s268_s0] sm:$0xff]  ;;  %v16_v5 = vld [vmem:[%s268_s0 + $0x8] sm:$0xff] }
   0x3   :  { %169 = vmatpush3.bf16.msra.mxu0 %v188_v0  ;;  %v19_v6 = vpack.c.bf16 %v16_v5, %v15_v4  ;;  %v192_v7 = vld [vmem:[%s267_s1 + $0x20] sm:$0xff]   ;;  %v193_v8 = vld [vmem:[%s267_s1 + $0x28] sm:$0xff]   ;;  %v194_v9 = vld [vmem:[%s267_s1 + $0x30] sm:$0xff]  }
   0x4   :  { %170 = vmatprep.subr.bf16.mxu0 %v189_v1  ;;  %v195_v10 = vld [vmem:[%s267_s1 + $0x38] sm:$0xff]   ;;  %v17_v11 = vld [vmem:[%s268_s0 + $0x10] sm:$0xff]  ;;  %v149_v14 = vld [vmem:[%s269_s2] ss:$0 sm:$0xff] }
   0x5   :  { %184 = vmatprep.mubr.bf16.mxu0 %v19_v6  ;;  %v18_v12 = vld [vmem:[%s268_s0 + $0x18] sm:$0xff] }
   0x6   :  { %v20_v13 = vpack.c.bf16 %v18_v12, %v17_v11 }
   0x7   :  { %171 = vmatpush3.bf16.msra.mxu0 %v189_v1 }
   0x8   :  { %172 = vmatprep.subr.bf16.mxu0 %v190_v2 }
   0xb   :  { %173 = vmatpush3.bf16.msra.mxu0 %v190_v2 }
   0xc   :  { %174 = vmatprep.subr.bf16.mxu0 %v191_v3 }
   0xf   :  { %175 = vmatpush3.bf16.msra.mxu0 %v191_v3 }
  0x10   :  { %176 = vmatprep.subr.bf16.mxu0 %v192_v7 }
  0x13   :  { %177 = vmatpush3.bf16.msra.mxu0 %v192_v7 }
  0x14   :  { %178 = vmatprep.subr.bf16.mxu0 %v193_v8 }
  0x17   :  { %179 = vmatpush3.bf16.msra.mxu0 %v193_v8 }
  0x18   :  { %180 = vmatprep.subr.bf16.mxu0 %v194_v9 }
  0x1b   :  { %181 = vmatpush3.bf16.msra.mxu0 %v194_v9 }
  0x1c   :  { %182 = vmatprep.subr.bf16.mxu0 %v195_v10 }
  0x1f   :  { %183 = vmatpush3.bf16.msra.mxu0 %v195_v10 }
  0x22   :  { %185 = vmatmul.mubr.bf16.vlgmr.msra.gmra.mrb[0].mxu0 %v20_v13 }
  0xf5   :  { %v186_v15 = vpop.f32.mrb[0].mxu0 }
  0xf6   :  { %v135_v16 = vadd.f32 %v186_v15, %v149_v14  ;;  %v126_v17 = vpop.f32.mrb[1].mxu0 }
  0xf7   :  { %v127_v18 = vadd.f32 %v149_v14, %v126_v17  ;;  %v187_v19 = vpop.f32.mrb[2].mxu0 }
  0xf8   :  { %143 = vst [vmem:[%s270_s3 + $0x10] sm:$0xff] %v135_v16  ;;  %v138_v20 = vadd.f32 %v187_v19, %v149_v14  ;;  %v129_v21 = vpop.f32.mrb[3].mxu0 }
  0xf9   :  { %141 = vst [vmem:[%s270_s3] sm:$0xff] %v127_v18  ;;  %v130_v22 = vadd.f32 %v149_v14, %v129_v21 }
  0xfa   :  { %144 = vst [vmem:[%s270_s3 + $0x18] sm:$0xff] %v138_v20 }
  0xfb   :  { %142 = vst [vmem:[%s270_s3 + $0x8] sm:$0xff] %v130_v22 }

// kernel: autocorrelation_layer_forward.7
= control target key start
LH: loop header
LB: loop body
LE: loop exit
PB: predicated region body
PF: predicated region fallthrough
CT: control target
= control target key end

     0   :  { %s949_s0 = inlined_call_operand.vmem [shape: s32[2], index: 0, kind: input, shape index: {}]   ;;  %s950_s1 = inlined_call_operand.vmem [shape: f32[2,2], index: 1, kind: input, shape index: {}]   ;;  %s951_s2 = inlined_call_operand.vmem [shape: f32[2,16,128], index: 2, kind: input, shape index: {}]   ;;  %s952_s3 = inlined_call_operand.vmem [shape: bf16[128,128], index: 3, kind: input, shape index: {}]   ;;  %s953_s4 = inlined_call_operand.vmem [shape: f32[1,128], index: 4, kind: input, shape index: {}]   ;;  %s954_s5 = inlined_call_operand.hbm [shape: f32[2,16,128], index: 5, kind: output, shape index: {}]  }
   0x1   :  { %s10_s20 = sshll.u32 %s949_s0, 4  ;;  %s11_s20 = int_to_ptr.vmem [resolvable:$true] %s10_s20 }
   0x2   :  { %s632_s21 = scalar_lea.vmem %s11_s20, 16  ;;  %p637_p1 = scmp.lt.s32.totalorder %s11_s20, %s11_s20 }
   0x3   :  { %p633_p0 = scmp.ne.s32.totalorder %s11_s20, %s632_s21  ;;  %p638_p2 = scmp.lt.s32.totalorder %s632_s21, %s632_s21 }
   0x5   :  { %p639_p3 = por %p638_p2, %p637_p1 }
   0x7   :  { %p640_p4 = pnand %p639_p3, %p633_p0 }
   0x9   :  { %643 = shalt.err (!%p640_p4)  }
   0xa   :  { %s745_s22 = smov [#allocation4]  }
   0xb   :  { %13 = dma.vmem_to_smem %s11_s20, 16, %s745_s22, [#allocation3] }
   0xc   :  { %711 = dma.done.wait [#allocation3], 16 }
   0xd   :  { %712 = vsyncadd [#allocation3], 4294967280 }
   0xe   :  { %15 = sfence }
   0xf   :  { %16 = vsyncpa [#allocation7], 0 }
  0x10   :  { %17 = vsyncpa [#allocation6], 0 }
  0x11   :  { %19 = vsyncpa [#allocation6 + $0x1], 0  ;;  %s785_s23 = smov 0   ;;  %s787_s24 = smov 0  }
  0x12   :  { %s789_s0 = smov 0   ;;  %s791_s25 = smov 0  }
  0x13   :  { %s793_s26 = smov 0   ;;  %s795_s27 = smov 0  }
  0x14 LB: > { %s497_s28 = sadd.s32 4294967295, %s743_s27   ;;  %s498_s29 = sadd.s32 4294967294, %s743_s27   ;;  %s743_s27 = sphi %s795_s27, %s25_s27   ;;  %s739_s26 = sphi %s793_s26, %s963_s26   ;;  %s735_s25 = sphi %s791_s25, %s962_s25   ;;  %s731_s0 = sphi %s789_s0, %s961_s0   ;;  %s727_s24 = sphi %s787_s24, %s960_s24   ;;  %s723_s23 = sphi %s785_s23, %s959_s23  }
  0x15   : > { %s37_s30 = sadd.s32 1, %s739_s26  ;;  %s135_s6 = sadd.s32 1, %s731_s0 }
  0x16   : > { %p39_p5 = scmp.ge.s32.totalorder %s37_s30, 2  ;;  %p145_p6 = scmp.ne.s32.totalorder %s731_s0, %s727_s24 }
  0x17   : > { %p146_p7 = scmp.eq.s32.totalorder %s497_s28, 1  ;;  %p151_p8 = scmp.ne.s32.totalorder %s727_s24, %s723_s23 }
  0x18   : > { %s965_s30 = smov (%p39_p5, %s37_s30), 0  ;;  %p152_p10 = scmp.eq.s32.totalorder %s498_s29, 1 }
  0x19   : > { %p825_p9 = por %p146_p7, %p145_p6  ;;  %s130_s8 = ssub.s32 %s739_s26, %s965_s30 }
  0x1a   : > { %p499_p11 = scmp.ge.s32.totalorder %s743_s27, 1  ;;  %p133_p12 = scmp.eq.s32.totalorder %s130_s8, 0 }
  0x1b   : > { %p832_p13 = por %p152_p10, %p151_p8  ;;  %p159_p0 = scmp.lt.s32.totalorder %s743_s27, 3 }
  0x1c   : > { %s838_s10 = scalar_select %p133_p12, %s731_s0, %s135_s6  }
  0x1d   : > { %p840_p1 = pnand %p499_p11, %p159_p0  ;;  %p844_p2 = scmp.eq.s32.totalorder %s497_s28, 0 }
  0x1e   : > { %s172_s15 = sshll.u32 %s950_s1, 4  ;;  %s173_s15 = int_to_ptr.vmem [resolvable:$true] %s172_s15 }
  0x1f   : > { %p559_p3 = pneg %p840_p1  ;;  %s644_s16 = scalar_lea.vmem %s173_s15, 32 }
  0x20   : > { %p645_p5 = scmp.ne.s32.totalorder %s173_s15, %s644_s16  ;;  %p652_p10 = scmp.lt.s32.totalorder %s173_s15, %s173_s15 }
  0x21   : > { %p560_p4 = pnand %p844_p2, %p559_p3  ;;  %p653_p11 = scmp.lt.s32.totalorder %s644_s16, %s644_s16 }
  0x23   : > { %p646_p6 = pneg %p560_p4  ;;  %p654_p12 = por %p653_p11, %p652_p10 }
  0x25   : > { %p647_p7 = pnand %p646_p6, %p645_p5 }
  0x27   : > { %p648_p8 = pneg %p647_p7 }
  0x29   : > { %p655_p0 = pnand %p654_p12, %p648_p8 }
  0x2b   : > { %658 = shalt.err (!%p655_p0)
}
  0x2c   : > { %s746_s17 = smov [#allocation5]   ;;  %199 = sbr.rel (%p840_p1) target bundleno = 318 (0x13e), region = 36 }
  0x2d   : > { %562 = dma.vmem_to_smem (!%p560_p4), %s173_s15, 32, %s746_s17, [#allocation7]  }
  0x33   : > { %714 = dma.done.wait (%p844_p2), [#allocation7], 32  }
  0x34   : > { %716 = vsyncadd (%p844_p2), [#allocation7], 4294967264 }
  0x35   : > { %205 = sfence }
  0x36   : > { %v624_v0 = vld [vmem:[%s952_s3] sm:$0xff]   ;;  %v747_v1 = vmov 0.0   ;;  %v625_v2 = vld [vmem:[%s952_s3 + $0x8] sm:$0xff]   ;;  %vm748_vm0 = vmmov 0   ;;  %p226_p1 = scmp.lt.s32.totalorder %s735_s25, 1  ;;  %s506_s22 = sshll.u32 %s735_s25, 7 }
  0x37   : > { %533 = vmatprep.subr.bf16.mxu0 %v747_v1  ;;  %245 = vst [vmem:[#allocation2 + $0x20] sm:$0xff] %v747_v1  ;;  %246 = vst [vmem:[#allocation2 + $0x28] sm:$0xff] %v747_v1  ;;  %549 = vmatprep.mubr.msk.bf16.mxu0 %vm748_vm0, %v747_v1  ;;  %v626_v3 = vld [vmem:[%s952_s3 + $0x10] sm:$0xff]   ;;  %s261_s14 = sadd.s32 1, %s506_s22  ;;  %s248_s15 = sld [smem:[#allocation4]]  ;;  %v627_v6 = vld [vmem:[%s952_s3 + $0x18] sm:$0xff]  }
  0x38   : > { %534 = vmatpush3.bf16.msra.mxu0 %v624_v0  ;;  %s227_s28 = scalar_select %p226_p1, %s735_s25, 1  ;;  %v628_v7 = vld [vmem:[%s952_s3 + $0x20] sm:$0xff]   ;;  %v629_v8 = vld [vmem:[%s952_s3 + $0x28] sm:$0xff]   ;;  %v630_v19 = vld [vmem:[%s952_s3 + $0x30] sm:$0xff]  }
  0x39   : > { %535 = vmatprep.subr.bf16.mxu0 %v747_v1  ;;  %s507_s16 = sld [smem:[#allocation4 + $0x1]]  ;;  %v631_v22 = vld [vmem:[%s952_s3 + $0x38] sm:$0xff]   ;;  %v508_v24 = vld [vmem:[%s953_s4] ss:$0 sm:$0xff]  ;;  %s523_s21 = sshll.u32 %s735_s25, 8 }
  0x3a   : > { %s522_s8 = sshll.u32 %s227_s28, 4  ;;  %s250_s17 = sld [smem:[#allocation5 + %s506_s22]] }
  0x3b   : > { %s230_s13 = scalar_lea.vmem %s951_s2, %s522_s8  ;;  %s262_s20 = sld [smem:[#allocation5 + %s261_s14]] }
  0x3c   : > { %536 = vmatpush3.bf16.msra.mxu0 %v625_v2  ;;  %v237_v4 = vld [vmem:[%s230_s13] sm:$0xff]  ;;  %v238_v5 = vld [vmem:[%s230_s13 + $0x8] sm:$0xff]  ;;  %s901_s6 = scalar_lea.hbm %s954_s5, %s523_s21 }
  0x3d   : > { %537 = vmatprep.subr.bf16.mxu0 %v747_v1  ;;  %239 = vst [vmem:[#allocation2] sm:$0xff] %v237_v4  ;;  %240 = vst [vmem:[#allocation2 + $0x8] sm:$0xff] %v238_v5  ;;  %s252_s8 = scalar_lea.vmem [#allocation2], %s248_s15  ;;  %s223_s15 = sand.u32 1, %s727_s24  }
  0x3e   : > { %243 = vst [vmem:[#allocation2 + $0x10] sm:$0xff] %v237_v4  ;;  %244 = vst [vmem:[#allocation2 + $0x18] sm:$0xff] %v238_v5 }
  0x3f   : > { %s264_s22 = scalar_lea.vmem [#allocation2], %s507_s16  ;;  %s503_s16 = sshll.u32 %s223_s15, 4 }
  0x40   : > { %538 = vmatpush3.bf16.msra.mxu0 %v626_v3  ;;  %v255_v10 = vstv %s250_s17  ;;  %s225_s19 = scalar_lea.vmem [#allocation8], %s503_s16 }
  0x41   : > { %539 = vmatprep.subr.bf16.mxu0 %v747_v1  ;;  %v267_v14 = vstv %s262_s20  ;;  %s403_s20 = sshll.u32 %s225_s19, 4  ;;  %s896_s20 = int_to_ptr.vmem [resolvable:$true] %s403_s20 }
  0x42   : > { %s659_s25 = scalar_lea.vmem %s896_s20, 256 }
  0x43   : > { %p660_p2 = scmp.ne.s32.totalorder %s896_s20, %s659_s25 }
  0x44   : > { %540 = vmatpush3.bf16.msra.mxu0 %v627_v6 }
  0x45   : > { %541 = vmatprep.subr.bf16.mxu0 %v747_v1  ;;  %v253_v9 = vld [vmem:[%s252_s8] sm:$0xff]  ;;  %v254_v11 = vld [vmem:[%s252_s8 + $0x8] sm:$0xff]  ;;  %s903_s8 = scalar_lea.sflag [#allocation6], %s223_s15  ;;  %p661_p3 = pnand %p660_p2, %p825_p9 }
  0x46   : > { %v265_v12 = vld [vmem:[%s264_s22] sm:$0xff]  ;;  %v266_v13 = vld [vmem:[%s264_s22 + $0x8] sm:$0xff]  ;;  %v256_v15 = vmul.f32 %v255_v10, %v253_v9  ;;  %v257_v16 = vmul.f32 %v255_v10, %v254_v11  ;;  %s749_s22 = smov [#allocation8]  }
  0x47   : > { %v268_v17 = vmul.f32 %v267_v14, %v265_v12  ;;  %v269_v18 = vmul.f32 %v267_v14, %v266_v13  ;;  %p662_p4 = pneg %p661_p3  ;;  %s663_s11 = sshll.u32 %s749_s22, 4  ;;  %s664_s11 = int_to_ptr.vmem [resolvable:$false] %s663_s11 }
  0x48   : > { %542 = vmatpush3.bf16.msra.mxu0 %v628_v7  ;;  %s665_s12 = scalar_lea.vmem %s664_s11, 512  ;;  %p666_p5 = scmp.lt.s32.totalorder %s896_s20, %s664_s11 }
  0x49   : > { %543 = vmatprep.subr.bf16.mxu0 %v747_v1  ;;  %v270_v20 = vadd.f32 %v268_v17, %v256_v15  ;;  %v271_v21 = vadd.f32 %v269_v18, %v257_v16  ;;  %p667_p6 = scmp.lt.s32.totalorder %s665_s12, %s659_s25 }
  0x4b   : > { %v272_v23 = vpack.c.bf16 %v271_v21, %v270_v20  ;;  %p668_p7 = por %p667_p6, %p666_p5 }
  0x4c   : > { %544 = vmatpush3.bf16.msra.mxu0 %v629_v8 }
  0x4d   : > { %545 = vmatprep.subr.bf16.mxu0 %v747_v1  ;;  %p669_p8 = pnand %p668_p7, %p662_p4 }
  0x50   : > { %546 = vmatpush3.bf16.msra.mxu0 %v630_v19 }
  0x51   : > { %547 = vmatprep.subr.bf16.mxu0 %v747_v1 }
  0x54   : > { %548 = vmatpush3.bf16.msra.mxu0 %v631_v22 }
  0x57   : > { %550 = vmatmul.mubr.bf16.vlgmr.msra.gmra.mrb[0].mxu0 %v272_v23 }
 0x12a   : > { %v378_v25 = vpop.f32.mrb[0].mxu0 }
 0x12b   : > { %v379_v26 = vadd.f32 %v508_v24, %v378_v25  ;;  %v551_v27 = vpop.f32.mrb[1].mxu0 }
 0x12c   : > { %v381_v28 = vpop.f32.mrb[2].mxu0 }
 0x12d   : > { %385 = vst [vmem:[%s225_s19] sm:$0xff] %v379_v26  ;;  %v382_v29 = vadd.f32 %v508_v24, %v381_v28  ;;  %v552_v30 = vpop.f32.mrb[3].mxu0 }
 0x12f   : > { %386 = vst [vmem:[%s225_s19 + $0x8] sm:$0xff] %v382_v29 }
 0x130   : > { %672 = shalt.err (!%p669_p8)
}
 0x131   : > { %s673_s13 = scalar_lea.hbm %s901_s6, 256  ;;  %s677_s16 = scalar_lea.hbm %s954_s5, 512 }
 0x132   : > { %p674_p10 = scmp.ne.s32.totalorder %s901_s6, %s673_s13  ;;  %p678_p0 = scmp.lt.u32.totalorder %s901_s6, %s954_s5 }
 0x133   : > { %p679_p1 = scmp.lt.u32.totalorder %s677_s16, %s673_s13  ;;  %p681_p3 = scmp.lt.u32.totalorder %s673_s13, %s901_s6 }
 0x134   : > { %p675_p11 = pnand %p674_p10, %p825_p9 }
 0x135   : > { %p680_p2 = por %p679_p1, %p678_p0 }
 0x136   : > { %p676_p12 = pneg %p675_p11 }
 0x137   : > { %p682_p4 = por %p681_p3, %p680_p2 }
 0x139   : > { %p683_p5 = pnand %p682_p4, %p676_p12 }
 0x13b   : > { %686 = shalt.err (!%p683_p5)
}
 0x13c   : > { %s750_s19 = smov 128   ;;  %s751_s21 = smov 8  }
 0x13d   : > { %557 = dma.vmem_to_hbm [thread:$0]  (%p825_p9), %s896_s20, 256, %s901_s6, %s903_s8, %s750_s19, %s750_s19, %s751_s21  }
 0x13e PF: > { %p569_p6 = scmp.ge.s32.totalorder %s743_s27, 2  ;;  %s418_s28 = sand.u32 1, %s723_s23  }
 0x13f   : > { %s419_s29 = scalar_lea.sflag [#allocation6], %s418_s28 }
 0x140   : > { %p564_p7 = pnand %p569_p6, %p832_p13 }
 0x142   : > { %718 = dma.done.wait (!%p564_p7), %s419_s29, 256  }
 0x143   : > { %720 = vsyncadd (!%p564_p7), %s419_s29, 4294967040  ;;  %s25_s27 = sadd.s32 1, %s743_s27   ;;  %s959_s23 = smov %s727_s24 }
 0x144   : > { %p22_p8 = scmp.ge.s32.totalorder %s25_s27, 4   ;;  %s960_s24 = smov %s731_s0 }
 0x145   : > { %s961_s0 = smov %s838_s10  ;;  %s962_s25 = smov %s739_s26 }
 0x146   : > { %s963_s26 = smov %s965_s30  ;;  %24 = sbr.rel (!%p22_p8) target bundleno = 20 (0x14), region = 82 }
 0x14d   :  { %424 = vsyncpa [#allocation6], 1 }
 0x14e   :  { %426 = vsyncpa [#allocation6 + $0x1], 1 }
 0x14f   :  { %427 = vsyncpa [#allocation7], 1 }
 0x150   :  { %429 = vsyncpa [#allocation7 + $0x1], 1 }

// kernel: reverse.0
= control target key start
LH: loop header
LB: loop body
LE: loop exit
PB: predicated region body
PF: predicated region fallthrough
CT: control target
= control target key end

     0   :  { %v40_v2 = vld [vmem:[#allocation0 + $0x7] ss:$-1 sm:$0xff]  ;;  %v47_v3 = vlaneseq  ;;  %v54_v5 = vld [vmem:[#allocation0 + $0x17] ss:$-1 sm:$0xff]  ;;  %s135_s0 = inlined_call_operand.vmem [shape: f32[2,128,7], index: 0, kind: input, shape index: {}]   ;;  %s136_s1 = inlined_call_operand.vmem [shape: f32[2,128,7], index: 1, kind: output, shape index: {}]  }
   0x1   :  { %v32_v0 = vld [vmem:[%s135_s0] sm:$0xff]  ;;  %v34_v1 = vld [vmem:[%s135_s0 + $0x8] sm:$0xff]  ;;  %v41_v4 = vrot.slane %v40_v2, 1  ;;  %v55_v6 = vrot.slane %v54_v5, 1 }
   0x2   :  { %33 = vst [vmem:[#allocation0 + $0x8] sm:$0xff] %v32_v0  ;;  %35 = vst [vmem:[#allocation0 + $0x18] sm:$0xff] %v34_v1  ;;  %v48_v7 = vshrl.u32 %v47_v3, 7 }
   0x3   :  { %42 = vst [vmem:[#allocation1] sm:$0xff] %v41_v4  ;;  %56 = vst [vmem:[#allocation1 + $0x8] sm:$0xff] %v55_v6 }
   0x4   :  { %vm49_vm0 = vcmp.lt.s32.totalorder %v48_v7, 7 }
   0x9   :  { %v45_v8 = vld [vmem:[#allocation0 + $0xf] ss:$-1 sm:$0xff]  ;;  %v59_v9 = vld [vmem:[#allocation0 + $0x1f] ss:$-1 sm:$0xff] }
   0xa   :  { %v46_v10 = vrot.slane %v45_v8, 1  ;;  %v60_v11 = vrot.slane %v59_v9, 1 }
   0xc   :  { %50 = vst.msk [vmem:[#allocation1] sm:$0xff] %vm49_vm0, %v46_v10  ;;  %64 = vst.msk [vmem:[#allocation1 + $0x8] sm:$0xff] %vm49_vm0, %v60_v11 }
  0x13   :  { %v94_v12 = vld [vmem:[#allocation1] sm:$0xff]  ;;  %v96_v13 = vld [vmem:[#allocation1 + $0x8] sm:$0xff] }
  0x14   :  { %95 = vst [vmem:[%s136_s1] sm:$0xff] %v94_v12  ;;  %97 = vst [vmem:[%s136_s1 + $0x8] sm:$0xff] %v96_v13 }

// kernel: autocorrelation_layer_forward.5
= control target key start
LH: loop header
LB: loop body
LE: loop exit
PB: predicated region body
PF: predicated region fallthrough
CT: control target
= control target key end

     0   :  { %s267_s1 = inlined_call_operand.vmem [shape: bf16[128,128], index: 1, kind: input, shape index: {}]   ;;  %s268_s0 = inlined_call_operand.vmem [shape: f32[32,128], index: 0, kind: input, shape index: {}]   ;;  %s269_s2 = inlined_call_operand.vmem [shape: f32[1,128], index: 2, kind: input, shape index: {}]   ;;  %s270_s3 = inlined_call_operand.vmem [shape: f32[32,128], index: 3, kind: output, shape index: {}]  }
   0x1   :  { %v188_v0 = vld [vmem:[%s267_s1] sm:$0xff]   ;;  %v189_v1 = vld [vmem:[%s267_s1 + $0x8] sm:$0xff]   ;;  %v190_v2 = vld [vmem:[%s267_s1 + $0x10] sm:$0xff]  }
   0x2   :  { %168 = vmatprep.subr.bf16.mxu0 %v188_v0  ;;  %v191_v3 = vld [vmem:[%s267_s1 + $0x18] sm:$0xff]   ;;  %v15_v4 = vld [vmem:[%s268_s0] sm:$0xff]  ;;  %v16_v5 = vld [vmem:[%s268_s0 + $0x8] sm:$0xff] }
   0x3   :  { %169 = vmatpush3.bf16.msra.mxu0 %v188_v0  ;;  %v19_v6 = vpack.c.bf16 %v16_v5, %v15_v4  ;;  %v192_v7 = vld [vmem:[%s267_s1 + $0x20] sm:$0xff]   ;;  %v193_v8 = vld [vmem:[%s267_s1 + $0x28] sm:$0xff]   ;;  %v194_v9 = vld [vmem:[%s267_s1 + $0x30] sm:$0xff]  }
   0x4   :  { %170 = vmatprep.subr.bf16.mxu0 %v189_v1  ;;  %v195_v10 = vld [vmem:[%s267_s1 + $0x38] sm:$0xff]   ;;  %v17_v11 = vld [vmem:[%s268_s0 + $0x10] sm:$0xff]  ;;  %v149_v14 = vld [vmem:[%s269_s2] ss:$0 sm:$0xff] }
   0x5   :  { %184 = vmatprep.mubr.bf16.mxu0 %v19_v6  ;;  %v18_v12 = vld [vmem:[%s268_s0 + $0x18] sm:$0xff] }
   0x6   :  { %v20_v13 = vpack.c.bf16 %v18_v12, %v17_v11 }
   0x7   :  { %171 = vmatpush3.bf16.msra.mxu0 %v189_v1 }
   0x8   :  { %172 = vmatprep.subr.bf16.mxu0 %v190_v2 }
   0xb   :  { %173 = vmatpush3.bf16.msra.mxu0 %v190_v2 }
   0xc   :  { %174 = vmatprep.subr.bf16.mxu0 %v191_v3 }
   0xf   :  { %175 = vmatpush3.bf16.msra.mxu0 %v191_v3 }
  0x10   :  { %176 = vmatprep.subr.bf16.mxu0 %v192_v7 }
  0x13   :  { %177 = vmatpush3.bf16.msra.mxu0 %v192_v7 }
  0x14   :  { %178 = vmatprep.subr.bf16.mxu0 %v193_v8 }
  0x17   :  { %179 = vmatpush3.bf16.msra.mxu0 %v193_v8 }
  0x18   :  { %180 = vmatprep.subr.bf16.mxu0 %v194_v9 }
  0x1b   :  { %181 = vmatpush3.bf16.msra.mxu0 %v194_v9 }
  0x1c   :  { %182 = vmatprep.subr.bf16.mxu0 %v195_v10 }
  0x1f   :  { %183 = vmatpush3.bf16.msra.mxu0 %v195_v10 }
  0x22   :  { %185 = vmatmul.mubr.bf16.vlgmr.msra.gmra.mrb[0].mxu0 %v20_v13 }
  0xf5   :  { %v186_v15 = vpop.f32.mrb[0].mxu0 }
  0xf6   :  { %v135_v16 = vadd.f32 %v186_v15, %v149_v14  ;;  %v126_v17 = vpop.f32.mrb[1].mxu0 }
  0xf7   :  { %v127_v18 = vadd.f32 %v149_v14, %v126_v17  ;;  %v187_v19 = vpop.f32.mrb[2].mxu0 }
  0xf8   :  { %143 = vst [vmem:[%s270_s3 + $0x10] sm:$0xff] %v135_v16  ;;  %v138_v20 = vadd.f32 %v187_v19, %v149_v14  ;;  %v129_v21 = vpop.f32.mrb[3].mxu0 }
  0xf9   :  { %141 = vst [vmem:[%s270_s3] sm:$0xff] %v127_v18  ;;  %v130_v22 = vadd.f32 %v149_v14, %v129_v21 }
  0xfa   :  { %144 = vst [vmem:[%s270_s3 + $0x18] sm:$0xff] %v138_v20 }
  0xfb   :  { %142 = vst [vmem:[%s270_s3 + $0x8] sm:$0xff] %v130_v22 }

// kernel: autocorrelation_layer_forward.7
= control target key start
LH: loop header
LB: loop body
LE: loop exit
PB: predicated region body
PF: predicated region fallthrough
CT: control target
= control target key end

     0   :  { %s947_s0 = inlined_call_operand.vmem [shape: s32[2], index: 0, kind: input, shape index: {}]   ;;  %s948_s1 = inlined_call_operand.vmem [shape: f32[2,2], index: 1, kind: input, shape index: {}]   ;;  %s949_s2 = inlined_call_operand.vmem [shape: f32[2,16,128], index: 2, kind: input, shape index: {}]   ;;  %s950_s3 = inlined_call_operand.vmem [shape: bf16[128,128], index: 3, kind: input, shape index: {}]   ;;  %s951_s4 = inlined_call_operand.vmem [shape: f32[1,128], index: 4, kind: input, shape index: {}]   ;;  %s952_s5 = inlined_call_operand.hbm [shape: f32[2,16,128], index: 5, kind: output, shape index: {}]  }
   0x1   :  { %s10_s20 = sshll.u32 %s947_s0, 4  ;;  %s11_s20 = int_to_ptr.vmem [resolvable:$true] %s10_s20 }
   0x2   :  { %s630_s21 = scalar_lea.vmem %s11_s20, 16  ;;  %p635_p1 = scmp.lt.s32.totalorder %s11_s20, %s11_s20 }
   0x3   :  { %p631_p0 = scmp.ne.s32.totalorder %s11_s20, %s630_s21  ;;  %p636_p2 = scmp.lt.s32.totalorder %s630_s21, %s630_s21 }
   0x5   :  { %p637_p3 = por %p636_p2, %p635_p1 }
   0x7   :  { %p638_p4 = pnand %p637_p3, %p631_p0 }
   0x9   :  { %641 = shalt.err (!%p638_p4)  }
   0xa   :  { %s743_s22 = smov [#allocation4]  }
   0xb   :  { %13 = dma.vmem_to_smem %s11_s20, 16, %s743_s22, [#allocation3] }
   0xc   :  { %709 = dma.done.wait [#allocation3], 16 }
   0xd   :  { %710 = vsyncadd [#allocation3], 4294967280 }
   0xe   :  { %15 = sfence }
   0xf   :  { %16 = vsyncpa [#allocation7], 0 }
  0x10   :  { %17 = vsyncpa [#allocation6], 0 }
  0x11   :  { %19 = vsyncpa [#allocation6 + $0x1], 0  ;;  %s783_s23 = smov 0   ;;  %s785_s24 = smov 0  }
  0x12   :  { %s787_s0 = smov 0   ;;  %s789_s25 = smov 0  }
  0x13   :  { %s791_s26 = smov 0   ;;  %s793_s27 = smov 0  }
  0x14 LB: > { %s494_s28 = sadd.s32 4294967295, %s741_s27   ;;  %s495_s29 = sadd.s32 4294967294, %s741_s27   ;;  %s741_s27 = sphi %s793_s27, %s25_s27   ;;  %s737_s26 = sphi %s791_s26, %s961_s26   ;;  %s733_s25 = sphi %s789_s25, %s960_s25   ;;  %s729_s0 = sphi %s787_s0, %s959_s0   ;;  %s725_s24 = sphi %s785_s24, %s958_s24   ;;  %s721_s23 = sphi %s783_s23, %s957_s23  }
  0x15   : > { %s37_s30 = sadd.s32 1, %s737_s26  ;;  %s135_s6 = sadd.s32 1, %s729_s0 }
  0x16   : > { %p39_p5 = scmp.ge.s32.totalorder %s37_s30, 2  ;;  %p145_p6 = scmp.ne.s32.totalorder %s729_s0, %s725_s24 }
  0x17   : > { %p146_p7 = scmp.eq.s32.totalorder %s494_s28, 1  ;;  %p151_p8 = scmp.ne.s32.totalorder %s725_s24, %s721_s23 }
  0x18   : > { %s963_s30 = smov (%p39_p5, %s37_s30), 0  ;;  %p152_p10 = scmp.eq.s32.totalorder %s495_s29, 1 }
  0x19   : > { %p823_p9 = por %p146_p7, %p145_p6  ;;  %s130_s8 = ssub.s32 %s737_s26, %s963_s30 }
  0x1a   : > { %p496_p11 = scmp.ge.s32.totalorder %s741_s27, 1  ;;  %p133_p12 = scmp.eq.s32.totalorder %s130_s8, 0 }
  0x1b   : > { %p830_p13 = por %p152_p10, %p151_p8  ;;  %p159_p0 = scmp.lt.s32.totalorder %s741_s27, 3 }
  0x1c   : > { %s836_s10 = scalar_select %p133_p12, %s729_s0, %s135_s6  }
  0x1d   : > { %p838_p1 = pnand %p496_p11, %p159_p0  ;;  %p842_p2 = scmp.eq.s32.totalorder %s494_s28, 0 }
  0x1e   : > { %s172_s15 = sshll.u32 %s948_s1, 4  ;;  %s173_s15 = int_to_ptr.vmem [resolvable:$true] %s172_s15 }
  0x1f   : > { %p557_p3 = pneg %p838_p1  ;;  %s642_s16 = scalar_lea.vmem %s173_s15, 32 }
  0x20   : > { %p643_p5 = scmp.ne.s32.totalorder %s173_s15, %s642_s16  ;;  %p650_p10 = scmp.lt.s32.totalorder %s173_s15, %s173_s15 }
  0x21   : > { %p558_p4 = pnand %p842_p2, %p557_p3  ;;  %p651_p11 = scmp.lt.s32.totalorder %s642_s16, %s642_s16 }
  0x23   : > { %p644_p6 = pneg %p558_p4  ;;  %p652_p12 = por %p651_p11, %p650_p10 }
  0x25   : > { %p645_p7 = pnand %p644_p6, %p643_p5 }
  0x27   : > { %p646_p8 = pneg %p645_p7 }
  0x29   : > { %p653_p0 = pnand %p652_p12, %p646_p8 }
  0x2b   : > { %656 = shalt.err (!%p653_p0)
}
  0x2c   : > { %s744_s17 = smov [#allocation5]   ;;  %199 = sbr.rel (%p838_p1) target bundleno = 318 (0x13e), region = 36 }
  0x2d   : > { %560 = dma.vmem_to_smem (!%p558_p4), %s173_s15, 32, %s744_s17, [#allocation7]  }
  0x33   : > { %712 = dma.done.wait (%p842_p2), [#allocation7], 32  }
  0x34   : > { %714 = vsyncadd (%p842_p2), [#allocation7], 4294967264 }
  0x35   : > { %205 = sfence }
  0x36   : > { %v622_v0 = vld [vmem:[%s950_s3] sm:$0xff]   ;;  %v745_v1 = vmov 0.0   ;;  %v623_v2 = vld [vmem:[%s950_s3 + $0x8] sm:$0xff]   ;;  %vm746_vm0 = vmmov 0   ;;  %p226_p1 = scmp.lt.s32.totalorder %s733_s25, 1  ;;  %s504_s22 = sshll.u32 %s733_s25, 7 }
  0x37   : > { %531 = vmatprep.subr.bf16.mxu0 %v745_v1  ;;  %245 = vst [vmem:[#allocation2 + $0x20] sm:$0xff] %v745_v1  ;;  %246 = vst [vmem:[#allocation2 + $0x28] sm:$0xff] %v745_v1  ;;  %547 = vmatprep.mubr.msk.bf16.mxu0 %vm746_vm0, %v745_v1  ;;  %v624_v3 = vld [vmem:[%s950_s3 + $0x10] sm:$0xff]   ;;  %s261_s14 = sadd.s32 1, %s504_s22  ;;  %s248_s15 = sld [smem:[#allocation4]]  ;;  %v625_v6 = vld [vmem:[%s950_s3 + $0x18] sm:$0xff]  }
  0x38   : > { %532 = vmatpush3.bf16.msra.mxu0 %v622_v0  ;;  %s227_s28 = scalar_select %p226_p1, %s733_s25, 1  ;;  %v626_v7 = vld [vmem:[%s950_s3 + $0x20] sm:$0xff]   ;;  %v627_v8 = vld [vmem:[%s950_s3 + $0x28] sm:$0xff]   ;;  %v628_v19 = vld [vmem:[%s950_s3 + $0x30] sm:$0xff]  }
  0x39   : > { %533 = vmatprep.subr.bf16.mxu0 %v745_v1  ;;  %s505_s16 = sld [smem:[#allocation4 + $0x1]]  ;;  %v629_v22 = vld [vmem:[%s950_s3 + $0x38] sm:$0xff]   ;;  %v506_v24 = vld [vmem:[%s951_s4] ss:$0 sm:$0xff]  ;;  %s521_s21 = sshll.u32 %s733_s25, 8 }
  0x3a   : > { %s520_s8 = sshll.u32 %s227_s28, 4  ;;  %s250_s17 = sld [smem:[#allocation5 + %s504_s22]] }
  0x3b   : > { %s230_s13 = scalar_lea.vmem %s949_s2, %s520_s8  ;;  %s262_s20 = sld [smem:[#allocation5 + %s261_s14]] }
  0x3c   : > { %534 = vmatpush3.bf16.msra.mxu0 %v623_v2  ;;  %v237_v4 = vld [vmem:[%s230_s13] sm:$0xff]  ;;  %v238_v5 = vld [vmem:[%s230_s13 + $0x8] sm:$0xff]  ;;  %s899_s6 = scalar_lea.hbm %s952_s5, %s521_s21 }
  0x3d   : > { %535 = vmatprep.subr.bf16.mxu0 %v745_v1  ;;  %239 = vst [vmem:[#allocation2] sm:$0xff] %v237_v4  ;;  %240 = vst [vmem:[#allocation2 + $0x8] sm:$0xff] %v238_v5  ;;  %s252_s8 = scalar_lea.vmem [#allocation2], %s248_s15  ;;  %s223_s15 = sand.u32 1, %s725_s24  }
  0x3e   : > { %243 = vst [vmem:[#allocation2 + $0x10] sm:$0xff] %v237_v4  ;;  %244 = vst [vmem:[#allocation2 + $0x18] sm:$0xff] %v238_v5 }
  0x3f   : > { %s264_s22 = scalar_lea.vmem [#allocation2], %s505_s16  ;;  %s501_s16 = sshll.u32 %s223_s15, 4 }
  0x40   : > { %536 = vmatpush3.bf16.msra.mxu0 %v624_v3  ;;  %v255_v10 = vstv %s250_s17  ;;  %s225_s19 = scalar_lea.vmem [#allocation8], %s501_s16 }
  0x41   : > { %537 = vmatprep.subr.bf16.mxu0 %v745_v1  ;;  %v267_v14 = vstv %s262_s20  ;;  %s403_s20 = sshll.u32 %s225_s19, 4  ;;  %s894_s20 = int_to_ptr.vmem [resolvable:$true] %s403_s20 }
  0x42   : > { %s657_s25 = scalar_lea.vmem %s894_s20, 256 }
  0x43   : > { %p658_p2 = scmp.ne.s32.totalorder %s894_s20, %s657_s25 }
  0x44   : > { %538 = vmatpush3.bf16.msra.mxu0 %v625_v6 }
  0x45   : > { %539 = vmatprep.subr.bf16.mxu0 %v745_v1  ;;  %v253_v9 = vld [vmem:[%s252_s8] sm:$0xff]  ;;  %v254_v11 = vld [vmem:[%s252_s8 + $0x8] sm:$0xff]  ;;  %s901_s8 = scalar_lea.sflag [#allocation6], %s223_s15  ;;  %p659_p3 = pnand %p658_p2, %p823_p9 }
  0x46   : > { %v265_v12 = vld [vmem:[%s264_s22] sm:$0xff]  ;;  %v266_v13 = vld [vmem:[%s264_s22 + $0x8] sm:$0xff]  ;;  %v256_v15 = vmul.f32 %v255_v10, %v253_v9  ;;  %v257_v16 = vmul.f32 %v255_v10, %v254_v11  ;;  %s747_s22 = smov [#allocation8]  }
  0x47   : > { %v268_v17 = vmul.f32 %v267_v14, %v265_v12  ;;  %v269_v18 = vmul.f32 %v267_v14, %v266_v13  ;;  %p660_p4 = pneg %p659_p3  ;;  %s661_s11 = sshll.u32 %s747_s22, 4  ;;  %s662_s11 = int_to_ptr.vmem [resolvable:$false] %s661_s11 }
  0x48   : > { %540 = vmatpush3.bf16.msra.mxu0 %v626_v7  ;;  %s663_s12 = scalar_lea.vmem %s662_s11, 512  ;;  %p664_p5 = scmp.lt.s32.totalorder %s894_s20, %s662_s11 }
  0x49   : > { %541 = vmatprep.subr.bf16.mxu0 %v745_v1  ;;  %v270_v20 = vadd.f32 %v268_v17, %v256_v15  ;;  %v271_v21 = vadd.f32 %v269_v18, %v257_v16  ;;  %p665_p6 = scmp.lt.s32.totalorder %s663_s12, %s657_s25 }
  0x4b   : > { %v272_v23 = vpack.c.bf16 %v271_v21, %v270_v20  ;;  %p666_p7 = por %p665_p6, %p664_p5 }
  0x4c   : > { %542 = vmatpush3.bf16.msra.mxu0 %v627_v8 }
  0x4d   : > { %543 = vmatprep.subr.bf16.mxu0 %v745_v1  ;;  %p667_p8 = pnand %p666_p7, %p660_p4 }
  0x50   : > { %544 = vmatpush3.bf16.msra.mxu0 %v628_v19 }
  0x51   : > { %545 = vmatprep.subr.bf16.mxu0 %v745_v1 }
  0x54   : > { %546 = vmatpush3.bf16.msra.mxu0 %v629_v22 }
  0x57   : > { %548 = vmatmul.mubr.bf16.vlgmr.msra.gmra.mrb[0].mxu0 %v272_v23 }
 0x12a   : > { %v378_v25 = vpop.f32.mrb[0].mxu0 }
 0x12b   : > { %v379_v26 = vadd.f32 %v506_v24, %v378_v25  ;;  %v549_v27 = vpop.f32.mrb[1].mxu0 }
 0x12c   : > { %v381_v28 = vpop.f32.mrb[2].mxu0 }
 0x12d   : > { %385 = vst [vmem:[%s225_s19] sm:$0xff] %v379_v26  ;;  %v382_v29 = vadd.f32 %v506_v24, %v381_v28  ;;  %v550_v30 = vpop.f32.mrb[3].mxu0 }
 0x12f   : > { %386 = vst [vmem:[%s225_s19 + $0x8] sm:$0xff] %v382_v29 }
 0x130   : > { %670 = shalt.err (!%p667_p8)
}
 0x131   : > { %s671_s13 = scalar_lea.hbm %s899_s6, 256  ;;  %s675_s16 = scalar_lea.hbm %s952_s5, 512 }
 0x132   : > { %p672_p10 = scmp.ne.s32.totalorder %s899_s6, %s671_s13  ;;  %p676_p0 = scmp.lt.u32.totalorder %s899_s6, %s952_s5 }
 0x133   : > { %p677_p1 = scmp.lt.u32.totalorder %s675_s16, %s671_s13  ;;  %p679_p3 = scmp.lt.u32.totalorder %s671_s13, %s899_s6 }
 0x134   : > { %p673_p11 = pnand %p672_p10, %p823_p9 }
 0x135   : > { %p678_p2 = por %p677_p1, %p676_p0 }
 0x136   : > { %p674_p12 = pneg %p673_p11 }
 0x137   : > { %p680_p4 = por %p679_p3, %p678_p2 }
 0x139   : > { %p681_p5 = pnand %p680_p4, %p674_p12 }
 0x13b   : > { %684 = shalt.err (!%p681_p5)
}
 0x13c   : > { %s748_s19 = smov 128   ;;  %s749_s21 = smov 8  }
 0x13d   : > { %555 = dma.vmem_to_hbm [thread:$0]  (%p823_p9), %s894_s20, 256, %s899_s6, %s901_s8, %s748_s19, %s748_s19, %s749_s21  }
 0x13e PF: > { %p567_p6 = scmp.ge.s32.totalorder %s741_s27, 2  ;;  %s418_s28 = sand.u32 1, %s721_s23  }
 0x13f   : > { %s419_s29 = scalar_lea.sflag [#allocation6], %s418_s28 }
 0x140   : > { %p562_p7 = pnand %p567_p6, %p830_p13 }
 0x142   : > { %716 = dma.done.wait (!%p562_p7), %s419_s29, 256  }
 0x143   : > { %718 = vsyncadd (!%p562_p7), %s419_s29, 4294967040  ;;  %s25_s27 = sadd.s32 1, %s741_s27   ;;  %s957_s23 = smov %s725_s24 }
 0x144   : > { %p22_p8 = scmp.ge.s32.totalorder %s25_s27, 4   ;;  %s958_s24 = smov %s729_s0 }
 0x145   : > { %s959_s0 = smov %s836_s10  ;;  %s960_s25 = smov %s737_s26 }
 0x146   : > { %s961_s26 = smov %s963_s30  ;;  %24 = sbr.rel (!%p22_p8) target bundleno = 20 (0x14), region = 82 }
 0x14d   :  { %424 = vsyncpa [#allocation6], 1 }
 0x14e   :  { %426 = vsyncpa [#allocation6 + $0x1], 1 }
 0x14f   :  { %427 = vsyncpa [#allocation7], 1 }
 0x150   :  { %429 = vsyncpa [#allocation7 + $0x1], 1 }

</bundles_post_ra>
